<compile_context>
chip_gen: v6e
topology: v6e:2x2x1
jax: 0.10.0
libtpu: 0.0.40
codegen_flags: <defaults>
</compile_context>

<pallas_src>
from functools import partial

import numpy as np
import jax
import jax.numpy as jnp
from jax.experimental import pallas as pl
from jax.experimental.pallas import tpu as pltpu

# ----------------------------- UR3e constants ------------------------------
A_DH = [0.0, -0.24355, -0.2131, 0.0, 0.0, 0.0]
ALPHA_DH = [np.pi / 2, 0.0, 0.0, np.pi / 2, -np.pi / 2, 0.0]
D_DH = [0.15185, 0.0, 0.0, 0.13105, 0.08535, 0.0921]
LINK_ORDER = ['base', 'shoulder', 'upperarm', 'forearm', 'wrist1', 'wrist2', 'wrist3']
OFFSETS = {
    'base':     [0.0, 0.0, 0.0,      0.0,       0.0, np.pi],
    'shoulder': [0.0, 0.0, 0.0,      np.pi / 2, 0.0, np.pi],
    'upperarm': [0.0, 0.0, 0.12,     np.pi / 2, 0.0, -3 * np.pi / 2],
    'forearm':  [0.0, 0.0, 0.027,    np.pi / 2, 0.0, -np.pi / 2],
    'wrist1':   [0.0, 0.0, -0.104,   np.pi / 2, 0.0, 0.0],
    'wrist2':   [0.0, 0.0, -0.08535, 0.0,       0.0, 0.0],
    'wrist3':   [0.0, 0.0, -0.0921,  np.pi / 2, 0.0, 0.0],
}

LANE = 128           # lane padding granularity for the vertex axis
N_LINKS = 7          # real links
LP = 8               # link axis padded to 8 (one zero dummy link)
N_STEPS = 2          # grid steps (v7x megacore can split these across its 2 TCs)
LINKS_PER_STEP = LP // N_STEPS


# ------------------------------ Pallas kernel -------------------------------
def fused_transform_kernel(t_ref, m_ref, o_ref):
    # t_ref: (LINKS_PER_STEP, M_pad, 8)  this step's stacked batch transforms
    # m_ref: (LINKS_PER_STEP, 8, W)      this step's packed [V | N] mesh slabs
    # o_ref: (LINKS_PER_STEP, M_pad, W)  transformed [V | N] slabs (lane-dense)
    for i in range(LINKS_PER_STEP):      # unrolled; 4 back-to-back MXU pushes
        o_ref[i] = jnp.dot(t_ref[i], m_ref[i],
                           preferred_element_type=jnp.float32)


def transform_all_links(T_lhs, mesh_pack):
    """T_lhs: (LP, M_pad, 8); mesh_pack: (LP, 8, W). Returns (LP, M_pad, W)."""
    lp, M_pad, _ = T_lhs.shape
    W = mesh_pack.shape[2]
    lps = lp // N_STEPS
    return pl.pallas_call(
        fused_transform_kernel,
        out_shape=jax.ShapeDtypeStruct((lp, M_pad, W), jnp.float32),
        grid_spec=pltpu.PrefetchScalarGridSpec(
            num_scalar_prefetch=0,
            grid=(N_STEPS,),
            in_specs=[
                # per-step transform stack (tiny DMA, hidden under the slab DMA)
                pl.BlockSpec((lps, M_pad, 8), lambda s: (s, 0, 0)),
                # this step's lane-dense [V | N] mesh slabs
                pl.BlockSpec((lps, 8, W), lambda s: (s, 0, 0)),
            ],
            out_specs=pl.BlockSpec((lps, M_pad, W), lambda s: (s, 0, 0)),
        ),
        compiler_params=pltpu.CompilerParams(
            dimension_semantics=("parallel",)),
    )(T_lhs, mesh_pack)


# ---------------------- forward kinematics (plain JAX glue) -----------------
def dh_matrix(A_i, alpha_i, D_i, theta_i):
    """DH matrix, identical layout to URRobot.forward_kinematics. theta_i: (B,)."""
    c = jnp.cos(theta_i)
    s = jnp.sin(theta_i)
    ca = jnp.cos(jnp.float32(alpha_i))
    sa = jnp.sin(jnp.float32(alpha_i))
    z = jnp.zeros_like(c)
    o = jnp.ones_like(c)
    rows = jnp.stack(
        [c, -s * ca, s * sa, A_i * c,
         s, c * ca, -c * sa, A_i * s,
         z, sa * o, ca * o, D_i * o,
         z, z, z, o], axis=1)
    return rows.reshape(-1, 4, 4).astype(jnp.float32)


def fk_chain(pose, theta):
    """Returns list of 7 (B,4,4) transforms: [pose, pose@T0, ..., pose@T0..T5]."""
    Ts = [pose.astype(jnp.float32)]
    for i in range(6):
        Ti = dh_matrix(A_DH[i], ALPHA_DH[i], D_DH[i], theta[:, i])
        Ts.append(jnp.matmul(Ts[i], Ti, precision=jax.lax.Precision.HIGHEST))
    return Ts


# ----------------------- synthetic mesh construction ------------------------
def make_visual_offset(name):
    x, y, z, roll, pitch, yaw = OFFSETS[name]
    Rx = np.array([[1, 0, 0, 0],
                   [0, np.cos(roll), -np.sin(roll), 0],
                   [0, np.sin(roll), np.cos(roll), 0],
                   [0, 0, 0, 1]], np.float32)
    Ry = np.array([[np.cos(pitch), 0, np.sin(pitch), 0],
                   [0, 1, 0, 0],
                   [-np.sin(pitch), 0, np.cos(pitch), 0],
                   [0, 0, 0, 1]], np.float32)
    Rz = np.array([[np.cos(yaw), -np.sin(yaw), 0, 0],
                   [np.sin(yaw), np.cos(yaw), 0, 0],
                   [0, 0, 1, 0],
                   [0, 0, 0, 1]], np.float32)
    T = np.array([[1, 0, 0, x],
                  [0, 1, 0, y],
                  [0, 0, 1, z],
                  [0, 0, 0, 1]], np.float32)
    return (T @ Rz @ Ry @ Rx).astype(np.float32)


def make_packed_meshes(key, n_verts_per_link):
    # TODO(synk): real module loads .stl meshes with trimesh; synthetic
    # deterministic vertices/normals are generated instead (faces unused here).
    max_n = max(n_verts_per_link)
    n_pad = ((max_n + LANE - 1) // LANE) * LANE
    W = 2 * n_pad  # lanes: [0, n_pad) = vertices, [n_pad, W) = normals
    slabs = []
    for name, n in zip(LINK_ORDER, n_verts_per_link):
        key, k1, k2 = jax.random.split(key, 3)
        v3 = jax.random.normal(k1, (n, 3), jnp.float32) * 0.05
        nr3 = jax.random.normal(k2, (n, 3), jnp.float32)
        nr3 = nr3 / jnp.linalg.norm(nr3, axis=-1, keepdims=True)
        ones = jnp.ones((n, 1), jnp.float32)
        v4 = jnp.concatenate([v3, ones], axis=-1)       # (n, 4) homogeneous
        n4 = jnp.concatenate([nr3, ones], axis=-1)      # (n, 4) homogeneous
        T_off = jnp.asarray(make_visual_offset(name))   # applied at "load" time
        v4 = (T_off @ v4.T).T
        n4 = (T_off @ n4.T).T
        slab = jnp.zeros((8, W), jnp.float32)
        slab = slab.at[:4, :n].set(v4.T)
        slab = slab.at[:4, n_pad:n_pad + n].set(n4.T)
        slabs.append(slab)
    # pad the link axis to LP with a zero dummy slab (keeps the grid even)
    for _ in range(LP - len(slabs)):
        slabs.append(jnp.zeros((8, W), jnp.float32))
    mesh_pack = jnp.stack(slabs, axis=0)                # (LP, 8, W)
    return mesh_pack, n_pad


# --------------------------------- forward ----------------------------------
@partial(jax.jit, static_argnames=("n_verts_per_link", "n_pad"))
def ur_forward(pose, theta, mesh_pack, n_verts_per_link, n_pad):
    """Mirrors URRobot.forward: returns tuple of 7 vertex tensors + 7 normal
    tensors, each of shape (B, N_link, 3), float32.  Fully jitted so the FK
    chain, LHS packing, Pallas kernel and unpack fuse into one executable."""
    B = theta.shape[0]
    Ts = fk_chain(pose, theta)                  # list of 7 (B,4,4)
    T_stack = jnp.stack(Ts, axis=0)             # (7, B, 4, 4)

    # Fold batch into the matmul M dim: rows b*4..b*4+3 of the LHS hold T_b.
    M = 4 * B
    M_pad = max(8, ((M + 7) // 8) * 8)
    T_lhs = jnp.zeros((LP, M_pad, 8), jnp.float32)
    T_lhs = T_lhs.at[:N_LINKS, :M, :4].set(T_stack.reshape(N_LINKS, M, 4))

    out = transform_all_links(T_lhs, mesh_pack)  # (LP, M_pad, W), lane-dense

    # Glue (fused under jit): unpack to the PyTorch output convention (B, N, 3).
    out_v, out_n = [], []
    for idx, n in enumerate(n_verts_per_link):
        blk = out[idx, :M]                                  # (4B, W)
        v = blk[:, :n].reshape(B, 4, n)
        nm = blk[:, n_pad:n_pad + n].reshape(B, 4, n)
        out_v.append(jnp.transpose(v, (0, 2, 1))[:, :, :3])
        out_n.append(jnp.transpose(nm, (0, 2, 1))[:, :, :3])
    return tuple(out_v) + tuple(out_n)


def ur_forward_reference(pose, theta, mesh_pack, n_verts_per_link, n_pad):
    """Pure-JAX reference (no Pallas) for validation."""
    Ts = fk_chain(pose, theta)
    out_v, out_n = [], []
    for idx, n in enumerate(n_verts_per_link):
        V4 = mesh_pack[idx, :4, :n].T                       # (n, 4)
        N4 = mesh_pack[idx, :4, n_pad:n_pad + n].T          # (n, 4)
        T = Ts[idx]                                         # (B, 4, 4)
        v = jnp.einsum('bij,nj->bni', T, V4,
                       precision=jax.lax.Precision.HIGHEST)[:, :, :3]
        nm = jnp.einsum('bij,nj->bni', T, N4,
                        precision=jax.lax.Precision.HIGHEST)[:, :, :3]
        out_v.append(v)
        out_n.append(nm)
    return tuple(out_v) + tuple(out_n)


# ----------------------------------- main ------------------------------------
if __name__ == "__main__":
    key = jax.random.PRNGKey(0)
    k_mesh, k_theta, k_trans = jax.random.split(key, 3)

    B = 2
    n_verts_per_link = (150, 200, 180, 160, 140, 130, 120)
    mesh_pack, n_pad = make_packed_meshes(k_mesh, n_verts_per_link)

    theta = jax.random.uniform(k_theta, (B, 6), jnp.float32,
                               minval=-np.pi, maxval=np.pi)
    pose = jnp.tile(jnp.eye(4, dtype=jnp.float32)[None], (B, 1, 1))
    pose = pose.at[:, :3, 3].set(
        jax.random.normal(k_trans, (B, 3), jnp.float32) * 0.1)

    outputs = ur_forward(pose, theta, mesh_pack, n_verts_per_link, n_pad)
    outputs = jax.block_until_ready(outputs)

    # sanity: shapes and numerics against the pure-JAX reference
    refs = ur_forward_reference(pose, theta, mesh_pack, n_verts_per_link, n_pad)
    assert len(outputs) == 14
    for idx, (out, ref) in enumerate(zip(outputs, refs)):
        n = n_verts_per_link[idx % 7]
        assert out.shape == (B, n, 3), (idx, out.shape)
        assert out.dtype == jnp.float32
        np.testing.assert_allclose(np.asarray(out), np.asarray(ref),
                                   rtol=1e-4, atol=1e-4)

    print("KERNEL_OK")
</pallas_src>

<mosaic_0001>
module attributes {stable_mosaic.version = 11 : i64} {
  func.func @fused_transform_kernel(%arg0: i32, %arg1: memref<4x8x8xf32, #tpu.memory_space<vmem>>, %arg2: memref<4x8x512xf32, #tpu.memory_space<vmem>>, %arg3: memref<4x8x512xf32, #tpu.memory_space<vmem>>) attributes {dimension_semantics = [#tpu.dimension_semantics<parallel>], iteration_bounds = array<i64: 2>, scalar_prefetch = 0 : i64, scratch_operands = 0 : i64, tpu.core_type = #tpu.core_type<tc>, window_params = [{transform_indices = @transform_0, window_bounds = array<i64: 4, 8, 8>}, {transform_indices = @transform_1, window_bounds = array<i64: 4, 8, 512>}, {transform_indices = @transform_2, window_bounds = array<i64: 4, 8, 512>}]} {
    %c0 = arith.constant 0 : index
    %c0_0 = arith.constant 0 : index
    %c0_1 = arith.constant 0 : index
    %0 = vector.load %arg1[%c0, %c0_0, %c0_1] : memref<4x8x8xf32, #tpu.memory_space<vmem>>, vector<1x8x8xf32>
    %1 = vector.shape_cast %0 : vector<1x8x8xf32> to vector<8x8xf32>
    %c0_2 = arith.constant 0 : index
    %c0_3 = arith.constant 0 : index
    %c0_4 = arith.constant 0 : index
    %2 = vector.load %arg2[%c0_2, %c0_3, %c0_4] : memref<4x8x512xf32, #tpu.memory_space<vmem>>, vector<1x8x512xf32>
    %3 = vector.shape_cast %2 : vector<1x8x512xf32> to vector<8x512xf32>
    %cst = arith.constant dense<0.000000e+00> : vector<8x512xf32>
    %4 = tpu.matmul %1, %3, %cst {dimension_numbers = #tpu.dot_dimension_numbers<[1], [0], [0], [1], [0, 0, 1, 1], [], []>} : vector<8x8xf32>, vector<8x512xf32>, vector<8x512xf32> -> vector<8x512xf32>
    %c0_5 = arith.constant 0 : index
    %c0_6 = arith.constant 0 : index
    %c0_7 = arith.constant 0 : index
    %5 = vector.load %arg3[%c0_5, %c0_6, %c0_7] : memref<4x8x512xf32, #tpu.memory_space<vmem>>, vector<1x8x512xf32>
    %6 = vector.shape_cast %5 : vector<1x8x512xf32> to vector<8x512xf32>
    %7 = vector.shape_cast %4 : vector<8x512xf32> to vector<1x8x512xf32>
    tpu.vector_store %arg3[%c0_5, %c0_6, %c0_7], %7 {strides = array<i32>} : memref<4x8x512xf32, #tpu.memory_space<vmem>>, vector<1x8x512xf32>,
    %c1 = arith.constant 1 : index
    %c0_8 = arith.constant 0 : index
    %c0_9 = arith.constant 0 : index
    %8 = vector.load %arg1[%c1, %c0_8, %c0_9] : memref<4x8x8xf32, #tpu.memory_space<vmem>>, vector<1x8x8xf32>
    %9 = vector.shape_cast %8 : vector<1x8x8xf32> to vector<8x8xf32>
    %c1_10 = arith.constant 1 : index
    %c0_11 = arith.constant 0 : index
    %c0_12 = arith.constant 0 : index
    %10 = vector.load %arg2[%c1_10, %c0_11, %c0_12] : memref<4x8x512xf32, #tpu.memory_space<vmem>>, vector<1x8x512xf32>
    %11 = vector.shape_cast %10 : vector<1x8x512xf32> to vector<8x512xf32>
    %cst_13 = arith.constant dense<0.000000e+00> : vector<8x512xf32>
    %12 = tpu.matmul %9, %11, %cst_13 {dimension_numbers = #tpu.dot_dimension_numbers<[1], [0], [0], [1], [0, 0, 1, 1], [], []>} : vector<8x8xf32>, vector<8x512xf32>, vector<8x512xf32> -> vector<8x512xf32>
    %c1_14 = arith.constant 1 : index
    %c0_15 = arith.constant 0 : index
    %c0_16 = arith.constant 0 : index
    %13 = vector.load %arg3[%c1_14, %c0_15, %c0_16] : memref<4x8x512xf32, #tpu.memory_space<vmem>>, vector<1x8x512xf32>
    %14 = vector.shape_cast %13 : vector<1x8x512xf32> to vector<8x512xf32>
    %15 = vector.shape_cast %12 : vector<8x512xf32> to vector<1x8x512xf32>
    tpu.vector_store %arg3[%c1_14, %c0_15, %c0_16], %15 {strides = array<i32>} : memref<4x8x512xf32, #tpu.memory_space<vmem>>, vector<1x8x512xf32>,
    %c2 = arith.constant 2 : index
    %c0_17 = arith.constant 0 : index
    %c0_18 = arith.constant 0 : index
    %16 = vector.load %arg1[%c2, %c0_17, %c0_18] : memref<4x8x8xf32, #tpu.memory_space<vmem>>, vector<1x8x8xf32>
    %17 = vector.shape_cast %16 : vector<1x8x8xf32> to vector<8x8xf32>
    %c2_19 = arith.constant 2 : index
    %c0_20 = arith.constant 0 : index
    %c0_21 = arith.constant 0 : index
    %18 = vector.load %arg2[%c2_19, %c0_20, %c0_21] : memref<4x8x512xf32, #tpu.memory_space<vmem>>, vector<1x8x512xf32>
    %19 = vector.shape_cast %18 : vector<1x8x512xf32> to vector<8x512xf32>
    %cst_22 = arith.constant dense<0.000000e+00> : vector<8x512xf32>
    %20 = tpu.matmul %17, %19, %cst_22 {dimension_numbers = #tpu.dot_dimension_numbers<[1], [0], [0], [1], [0, 0, 1, 1], [], []>} : vector<8x8xf32>, vector<8x512xf32>, vector<8x512xf32> -> vector<8x512xf32>
    %c2_23 = arith.constant 2 : index
    %c0_24 = arith.constant 0 : index
    %c0_25 = arith.constant 0 : index
    %21 = vector.load %arg3[%c2_23, %c0_24, %c0_25] : memref<4x8x512xf32, #tpu.memory_space<vmem>>, vector<1x8x512xf32>
    %22 = vector.shape_cast %21 : vector<1x8x512xf32> to vector<8x512xf32>
    %23 = vector.shape_cast %20 : vector<8x512xf32> to vector<1x8x512xf32>
    tpu.vector_store %arg3[%c2_23, %c0_24, %c0_25], %23 {strides = array<i32>} : memref<4x8x512xf32, #tpu.memory_space<vmem>>, vector<1x8x512xf32>,
    %c3 = arith.constant 3 : index
    %c0_26 = arith.constant 0 : index
    %c0_27 = arith.constant 0 : index
    %24 = vector.load %arg1[%c3, %c0_26, %c0_27] : memref<4x8x8xf32, #tpu.memory_space<vmem>>, vector<1x8x8xf32>
    %25 = vector.shape_cast %24 : vector<1x8x8xf32> to vector<8x8xf32>
    %c3_28 = arith.constant 3 : index
    %c0_29 = arith.constant 0 : index
    %c0_30 = arith.constant 0 : index
    %26 = vector.load %arg2[%c3_28, %c0_29, %c0_30] : memref<4x8x512xf32, #tpu.memory_space<vmem>>, vector<1x8x512xf32>
    %27 = vector.shape_cast %26 : vector<1x8x512xf32> to vector<8x512xf32>
    %cst_31 = arith.constant dense<0.000000e+00> : vector<8x512xf32>
    %28 = tpu.matmul %25, %27, %cst_31 {dimension_numbers = #tpu.dot_dimension_numbers<[1], [0], [0], [1], [0, 0, 1, 1], [], []>} : vector<8x8xf32>, vector<8x512xf32>, vector<8x512xf32> -> vector<8x512xf32>
    %c3_32 = arith.constant 3 : index
    %c0_33 = arith.constant 0 : index
    %c0_34 = arith.constant 0 : index
    %29 = vector.load %arg3[%c3_32, %c0_33, %c0_34] : memref<4x8x512xf32, #tpu.memory_space<vmem>>, vector<1x8x512xf32>
    %30 = vector.shape_cast %29 : vector<1x8x512xf32> to vector<8x512xf32>
    %31 = vector.shape_cast %28 : vector<8x512xf32> to vector<1x8x512xf32>
    tpu.vector_store %arg3[%c3_32, %c0_33, %c0_34], %31 {strides = array<i32>} : memref<4x8x512xf32, #tpu.memory_space<vmem>>, vector<1x8x512xf32>,
    return
  }
  func.func @transform_0(%arg0: i32) -> (i32, i32, i32) {
    %c0_i32 = arith.constant 0 : i32
    %c0_i32_0 = arith.constant 0 : i32
    %c0_i32_1 = arith.constant 0 : i32
    return %arg0, %c0_i32, %c0_i32_0 : i32, i32, i32
  }
  func.func @transform_1(%arg0: i32) -> (i32, i32, i32) {
    %c0_i32 = arith.constant 0 : i32
    %c0_i32_0 = arith.constant 0 : i32
    %c0_i32_1 = arith.constant 0 : i32
    return %arg0, %c0_i32, %c0_i32_0 : i32, i32, i32
  }
  func.func @transform_2(%arg0: i32) -> (i32, i32, i32) {
    %c0_i32 = arith.constant 0 : i32
    %c0_i32_0 = arith.constant 0 : i32
    %c0_i32_1 = arith.constant 0 : i32
    return %arg0, %c0_i32, %c0_i32_0 : i32, i32, i32
  }
}

</mosaic_0001>

<bundles_post_ra>
// kernel: ur_forward.1
= control target key start
LH: loop header
LB: loop body
LE: loop exit
PB: predicated region body
PF: predicated region fallthrough
CT: control target
= control target key end

     0   :  { %s955_s9 = smov 0   ;;  %s1033_s0 = inlined_call_operand.vmem [shape: f32[8,8,8], index: 0, kind: input, shape index: {}]   ;;  %s1034_s1 = inlined_call_operand.vmem [shape: f32[8,8,512], index: 1, kind: input, shape index: {}]   ;;  %s1035_s2 = inlined_call_operand.vmem [shape: f32[8,8,512], index: 2, kind: output, shape index: {}]  }
   0x1 LB: > { %s870_s10 = sadd.s32 4294967295, %s937_s9   ;;  %p874_p0 = scmp.ge.s32.totalorder %s937_s9, 1  ;;  %s937_s9 = sphi %s955_s9, %s12_s9  }
   0x2   : > { %p125_p1 = scmp.lt.s32.totalorder %s937_s9, 3 }
   0x4   : > { %p126_p2 = pnand %p874_p0, %p125_p1 }
   0x5   : > { %s875_s11 = sshll.u32 (!%p126_p2), %s870_s10, 2 }
   0x6   : > { %129 = sbr.rel (%p126_p2) target bundleno = 225 (0xe1), region = 28  ;;  %p155_p3 = scmp.lt.s32.totalorder (!%p126_p2), %s875_s11, 7 }
   0xb   : > { %v939_v0 = vmov 0.0   ;;  %s1037_s11 = smov (!%p155_p3, %s875_s11), 7  ;;  %vm179_vm0 = vcmask 64512  }
   0xc   : > { %247 = vmatprep.mubr.f32.mxu0 %v939_v0  ;;  %318 = vmatprep.mubr.f32.mxu1 %v939_v0  ;;  %s920_s12 = sshll.u32 %s1037_s11, 5  ;;  %s876_s13 = sshll.u32 %s1037_s11, 3 }
   0xd   : > { %s972_s16 = scalar_lea.vmem %s1034_s1, %s920_s12  ;;  %s977_s19 = scalar_lea.vmem %s1033_s0, %s876_s13 }
   0xe   : > { %v176_v1 = vld [vmem:[%s972_s16 + $0x8] sm:$0xff]  ;;  %v178_v2 = vld [vmem:[%s972_s16 + $0x18] sm:$0xff]  ;;  %v175_v3 = vld [vmem:[%s972_s16] sm:$0xff]  ;;  %s1012_s22 = scalar_lea.vmem %s1035_s2, %s920_s12 }
   0xf   : > { %213 = vmatprep.subr.mxu0 %v176_v1  ;;  %284 = vmatprep.subr.mxu1 %v178_v2  ;;  %v177_v4 = vld [vmem:[%s972_s16 + $0x10] sm:$0xff]  ;;  %v174_v5 = vld [vmem:[%s977_s19] sm:$0xff]  ;;  %v887_v6 = vld [vmem:[%s972_s16 + $0x28] sm:$0xff] }
  0x10   : > { %214 = vmatpush1.msra.mxu0 %v175_v3  ;;  %285 = vmatpush1.msra.mxu1 %v177_v4  ;;  %v889_v7 = vld [vmem:[%s972_s16 + $0x38] sm:$0xff]  ;;  %v886_v8 = vld [vmem:[%s972_s16 + $0x20] sm:$0xff]  ;;  %v888_v9 = vld [vmem:[%s972_s16 + $0x30] sm:$0xff] }
  0x11   : > { %883 = vmatmul.mubr.msk.f32.vlgmr.msra.gmra.mxu0 %vm179_vm0, %v174_v5  ;;  %884 = vmatmul.mubr.msk.f32.vlgmr.msra.gmra.mxu1 %vm179_vm0, %v174_v5  ;;  %v885_v10 = vld [vmem:[%s977_s19 + $0x8] sm:$0xff]  ;;  %v900_v12 = vld [vmem:[%s972_s16 + $0x58] sm:$0xff]  ;;  %v897_v13 = vld [vmem:[%s972_s16 + $0x40] sm:$0xff] }
  0x12   : > { %369 = vmatprep.subr.mxu0 %v887_v6  ;;  %440 = vmatprep.subr.mxu1 %v889_v7  ;;  %v898_v11 = vld [vmem:[%s972_s16 + $0x48] sm:$0xff]  ;;  %v899_v14 = vld [vmem:[%s972_s16 + $0x50] sm:$0xff]  ;;  %v911_v17 = vld [vmem:[%s972_s16 + $0x78] sm:$0xff] }
  0x13   : > { %370 = vmatpush1.msra.mxu0 %v886_v8  ;;  %441 = vmatpush1.msra.mxu1 %v888_v9  ;;  %v896_v15 = vld [vmem:[%s977_s19 + $0x10] sm:$0xff]  ;;  %v909_v16 = vld [vmem:[%s972_s16 + $0x68] sm:$0xff]  ;;  %v908_v18 = vld [vmem:[%s972_s16 + $0x60] sm:$0xff] }
  0x14   : > { %403 = vmatprep.mubr.f32.mxu0 %v939_v0  ;;  %474 = vmatprep.mubr.f32.mxu1 %v939_v0  ;;  %v910_v19 = vld [vmem:[%s972_s16 + $0x70] sm:$0xff]  ;;  %v907_v20 = vld [vmem:[%s977_s19 + $0x18] sm:$0xff] }
  0x15   : > { %890 = vmatmul.mubr.msk.f32.vlgmr.msra.gmra.mxu0 %vm179_vm0, %v885_v10  ;;  %891 = vmatmul.mubr.msk.f32.vlgmr.msra.gmra.mxu1 %vm179_vm0, %v885_v10 }
  0x16   : > { %526 = vmatprep.subr.mxu0 %v898_v11  ;;  %597 = vmatprep.subr.mxu1 %v900_v12 }
  0x17   : > { %527 = vmatpush1.msra.mxu0 %v897_v13  ;;  %598 = vmatpush1.msra.mxu1 %v899_v14 }
  0x18   : > { %560 = vmatprep.mubr.f32.mxu0 %v939_v0  ;;  %631 = vmatprep.mubr.f32.mxu1 %v939_v0 }
  0x19   : > { %901 = vmatmul.mubr.msk.f32.vlgmr.msra.gmra.mxu0 %vm179_vm0, %v896_v15  ;;  %902 = vmatmul.mubr.msk.f32.vlgmr.msra.gmra.mxu1 %vm179_vm0, %v896_v15 }
  0x1a   : > { %683 = vmatprep.subr.mxu0 %v909_v16  ;;  %754 = vmatprep.subr.mxu1 %v911_v17 }
  0x1b   : > { %684 = vmatpush1.msra.mxu0 %v908_v18  ;;  %755 = vmatpush1.msra.mxu1 %v910_v19 }
  0x1c   : > { %717 = vmatprep.mubr.f32.mxu0 %v939_v0  ;;  %788 = vmatprep.mubr.f32.mxu1 %v939_v0 }
  0x1d   : > { %912 = vmatmul.mubr.msk.f32.vlgmr.msra.gmra.mxu0 %vm179_vm0, %v907_v20  ;;  %913 = vmatmul.mubr.msk.f32.vlgmr.msra.gmra.mxu1 %vm179_vm0, %v907_v20 }
  0xd1   : > { %v249_v21 = vpop.f32.mrf.mxu0  ;;  %v320_v22 = vpop.f32.mrf.mxu1 }
  0xd2   : > { %325 = vst [vmem:[%s1012_s22] sm:$0xff] %v249_v21  ;;  %327 = vst [vmem:[%s1012_s22 + $0x10] sm:$0xff] %v320_v22 }
  0xd3   : > { %v251_v23 = vpop.f32.mrf.mxu0  ;;  %v322_v24 = vpop.f32.mrf.mxu1 }
  0xd4   : > { %326 = vst [vmem:[%s1012_s22 + $0x8] sm:$0xff] %v251_v23  ;;  %328 = vst [vmem:[%s1012_s22 + $0x18] sm:$0xff] %v322_v24 }
  0xd5   : > { %v405_v25 = vpop.f32.mrf.mxu0  ;;  %v476_v26 = vpop.f32.mrf.mxu1 }
  0xd6   : > { %892 = vst [vmem:[%s1012_s22 + $0x20] sm:$0xff] %v405_v25  ;;  %894 = vst [vmem:[%s1012_s22 + $0x30] sm:$0xff] %v476_v26 }
  0xd7   : > { %v407_v27 = vpop.f32.mrf.mxu0  ;;  %v478_v28 = vpop.f32.mrf.mxu1 }
  0xd8   : > { %893 = vst [vmem:[%s1012_s22 + $0x28] sm:$0xff] %v407_v27  ;;  %895 = vst [vmem:[%s1012_s22 + $0x38] sm:$0xff] %v478_v28 }
  0xd9   : > { %v562_v29 = vpop.f32.mrf.mxu0  ;;  %v633_v30 = vpop.f32.mrf.mxu1 }
  0xda   : > { %903 = vst [vmem:[%s1012_s22 + $0x40] sm:$0xff] %v562_v29  ;;  %905 = vst [vmem:[%s1012_s22 + $0x50] sm:$0xff] %v633_v30 }
  0xdb   : > { %v564_v31 = vpop.f32.mrf.mxu0  ;;  %v635_v32 = vpop.f32.mrf.mxu1 }
  0xdc   : > { %904 = vst [vmem:[%s1012_s22 + $0x48] sm:$0xff] %v564_v31  ;;  %906 = vst [vmem:[%s1012_s22 + $0x58] sm:$0xff] %v635_v32 }
  0xdd   : > { %v719_v33 = vpop.f32.mrf.mxu0  ;;  %v790_v34 = vpop.f32.mrf.mxu1 }
  0xde   : > { %914 = vst [vmem:[%s1012_s22 + $0x60] sm:$0xff] %v719_v33  ;;  %916 = vst [vmem:[%s1012_s22 + $0x70] sm:$0xff] %v790_v34 }
  0xdf   : > { %v721_v35 = vpop.f32.mrf.mxu0  ;;  %v792_v36 = vpop.f32.mrf.mxu1 }
  0xe0   : > { %915 = vst [vmem:[%s1012_s22 + $0x68] sm:$0xff] %v721_v35  ;;  %917 = vst [vmem:[%s1012_s22 + $0x78] sm:$0xff] %v792_v36 }
  0xe1 PF: > { %s12_s9 = sadd.s32 1, %s937_s9  }
  0xe2   : > { %p9_p4 = scmp.ge.s32.totalorder %s12_s9, 4  }
  0xe4   :  { %11 = sbr.rel (!%p9_p4) target bundleno = 1 (0x1), region = 70 }

</bundles_post_ra>
